<compile_context>
chip_gen: v6e
topology: v6e:2x2x1
jax: 0.10.0
libtpu: 0.0.40
codegen_flags: <defaults>
</compile_context>

<pallas_src>
import functools

import jax
import jax.numpy as jnp
from jax.experimental import pallas as pl
from jax.experimental.pallas import tpu as pltpu


def _fusion_kernel(wn_ref, e0_ref, e1_ref, out_ref, *, d0):
    # wn_ref: (2,) post-softmax modal weights (f32), resident in SMEM.
    w0 = wn_ref[0]
    w1 = wn_ref[1]
    # Scale in f32 (DMA-bound kernel -> the extra VPU work is free) and cast
    # once at the store.  d0 is static and 128-aligned, so both stores are
    # lane-dense full-width vst's.
    out_ref[:, :d0] = (e0_ref[...].astype(jnp.float32) * w0).astype(out_ref.dtype)
    out_ref[:, d0:] = (e1_ref[...].astype(jnp.float32) * w1).astype(out_ref.dtype)


def _sublane_multiple(dtype):
    """Row granularity keeping sub-32-bit dtypes fully packed along sublanes."""
    return max(8, 32 // jnp.dtype(dtype).itemsize)   # f32: 8, bf16: 16, int8/fp8: 32


def _vmem_limits():
    """Return (vmem_limit_bytes, row-tile byte budget) for this TPU generation."""
    try:
        cap = int(pltpu.get_tpu_info().vmem_capacity_bytes)
    except Exception:
        cap = 64 * 2**20  # be conservative (v7x-sized per-TC VMEM)
    if cap >= 96 * 2**20:        # v5e / v6e: 128 MiB physical VMEM
        limit = 64 * 2**20
    else:                        # v7x: 64 MiB per TensorCore
        limit = 32 * 2**20
    # Leave ~25% of the scoped limit as headroom for Pallas internal scratch.
    return limit, (limit * 3) // 4


def _choose_row_tile(n, d_total, itemsize, budget_bytes, sublane):
    """Largest sublane-aligned row tile whose double-buffered set fits budget."""
    # 2x double-buffered input rows + 2x double-buffered output rows.
    per_row = 4 * d_total * itemsize
    tm = int(budget_bytes // max(per_row, 1))
    if tm < sublane:
        # TODO(synk): add a second (column) grid axis for very wide embeddings
        # instead of refusing; for now fail loudly rather than VMEM-OOM at compile.
        raise ValueError(
            f"d_total={d_total} is too wide for a {budget_bytes >> 20} MiB "
            f"row-tile budget (minimum tile needs {sublane * per_row} bytes)")
    # Force >= 2 grid steps whenever possible so both v7x TensorCores get work
    # under dimension_semantics=("parallel",).
    if n > sublane:
        tm = min(tm, pl.cdiv(pl.cdiv(n, 2), sublane) * sublane)
    tm = max(sublane, (tm // sublane) * sublane)
    return min(tm, n)


def multimodal_fusion(embs, weight, *, row_tile=None):
    """embs: list of 2 arrays [N, D_i]; weight: (2,) pre-softmax modal weights."""
    assert len(embs) == 2, "this kernel implements the modal_num=2 module"
    e0, e1 = embs
    assert e0.dtype == e1.dtype, "mixed-dtype embeddings are not supported"
    n, d0 = e0.shape
    n1, d1 = e1.shape
    assert n == n1, "embeddings must share the batch dimension"
    # Lane-dense concat: enforce 128-lane alignment of the split point so both
    # output stores are unmasked full-width vst's (don't silently degrade).
    assert d0 % 128 == 0, (
        f"d0={d0} must be a multiple of 128 for lane-aligned concat stores")
    # TODO(synk): the PyTorch module prints the modal weights in eval mode; the
    # host-side print has no kernel equivalent and is intentionally skipped.

    # Softmax over the 2 modal weights, hoisted out of the kernel (runs once).
    weight_norm = jax.nn.softmax(weight.astype(jnp.float32))

    d_total = d0 + d1
    itemsize = jnp.dtype(e0.dtype).itemsize
    sublane = _sublane_multiple(e0.dtype)
    vmem_limit, tile_budget = _vmem_limits()

    if row_tile is not None:
        tm = min(max(sublane, (int(row_tile) // sublane) * sublane), n)
    else:
        tm = _choose_row_tile(n, d_total, itemsize, tile_budget, sublane)
    grid = (pl.cdiv(n, tm),)

    kernel = functools.partial(_fusion_kernel, d0=d0)

    return pl.pallas_call(
        kernel,
        out_shape=jax.ShapeDtypeStruct((n, d_total), e0.dtype),
        grid=grid,
        in_specs=[
            # post-softmax weights: tiny scalar vector, lives in SMEM (not tiled)
            pl.BlockSpec(memory_space=pltpu.MemorySpace.SMEM),
            # row-tiled embeddings: auto double-buffered HBM->VMEM pipeline
            pl.BlockSpec((tm, d0), lambda i: (i, 0)),
            pl.BlockSpec((tm, d1), lambda i: (i, 0)),
        ],
        out_specs=pl.BlockSpec((tm, d_total), lambda i: (i, 0)),
        compiler_params=pltpu.CompilerParams(
            # row tiles are independent -> shard across v7x's 2 TensorCores
            dimension_semantics=("parallel",),
            vmem_limit_bytes=vmem_limit,
        ),
        # Memory-bound hint for XLA's scheduler (overlap with surrounding ops).
        cost_estimate=pl.CostEstimate(
            flops=n * d_total,
            transcendentals=0,
            bytes_accessed=2 * n * d_total * itemsize,
        ),
    )(weight_norm, e0, e1)


if __name__ == "__main__":
    key = jax.random.PRNGKey(0)
    k0, k1 = jax.random.split(key)

    # Small shapes consistent with the module: modal_num=2 embeddings [N, D].
    # D0 is a multiple of 128 so the concat split point is lane-aligned.
    N, D0, D1 = 256, 128, 128
    emb0 = jax.random.normal(k0, (N, D0), dtype=jnp.float32)
    emb1 = jax.random.normal(k1, (N, D1), dtype=jnp.float32)

    # deterministic parameter init, exactly as in __init__: Tensor([1, 0.2])
    weight = jnp.array([1.0, 0.2], dtype=jnp.float32)

    # reference (plain JAX)
    wn = jax.nn.softmax(weight)
    ref = jnp.concatenate([wn[0] * emb0, wn[1] * emb1], axis=1)

    # 1) auto-selected tile (forced >= 2 grid steps so both v7x TCs run)
    out = jax.block_until_ready(multimodal_fusion([emb0, emb1], weight))
    assert out.shape == (N, D0 + D1)
    assert jnp.allclose(out, ref, atol=1e-6, rtol=1e-6)

    # 2) forced smaller row tile to exercise the multi-step pipelined grid path
    out_tiled = jax.block_until_ready(
        multimodal_fusion([emb0, emb1], weight, row_tile=64))
    assert jnp.allclose(out_tiled, ref, atol=1e-6, rtol=1e-6)

    # 3) bf16 embeddings: exercises the f32-scale path + 16-row sublane rounding
    emb0_bf = emb0.astype(jnp.bfloat16)
    emb1_bf = emb1.astype(jnp.bfloat16)
    out_bf = jax.block_until_ready(multimodal_fusion([emb0_bf, emb1_bf], weight))
    ref_bf = jnp.concatenate(
        [(wn[0] * emb0_bf.astype(jnp.float32)).astype(jnp.bfloat16),
         (wn[1] * emb1_bf.astype(jnp.float32)).astype(jnp.bfloat16)], axis=1)
    assert out_bf.dtype == jnp.bfloat16
    assert jnp.allclose(out_bf.astype(jnp.float32), ref_bf.astype(jnp.float32),
                        atol=2e-2, rtol=2e-2)

    print("KERNEL_OK")
</pallas_src>

<mosaic_0001>
module attributes {stable_mosaic.version = 11 : i64} {
  func.func @_fusion_kernel(%arg0: i32, %arg1: memref<2xf32, #tpu.memory_space<smem>>, %arg2: memref<128x128xf32, #tpu.memory_space<vmem>>, %arg3: memref<128x128xf32, #tpu.memory_space<vmem>>, %arg4: memref<128x256xf32, #tpu.memory_space<vmem>>) attributes {dimension_semantics = [#tpu.dimension_semantics<parallel>], iteration_bounds = array<i64: 2>, scalar_prefetch = 0 : i64, scratch_operands = 0 : i64, tpu.core_type = #tpu.core_type<tc>, window_params = [{transform_indices = @transform_0, window_bounds = array<i64: 2>}, {transform_indices = @transform_1, window_bounds = array<i64: 128, 128>}, {transform_indices = @transform_2, window_bounds = array<i64: 128, 128>}, {transform_indices = @transform_3, window_bounds = array<i64: 128, 256>}]} {
    %c0 = arith.constant 0 : index
    %0 = memref.load %arg1[%c0] : memref<2xf32, #tpu.memory_space<smem>>
    %c1 = arith.constant 1 : index
    %1 = memref.load %arg1[%c1] : memref<2xf32, #tpu.memory_space<smem>>
    %c0_0 = arith.constant 0 : index
    %c0_1 = arith.constant 0 : index
    %2 = vector.load %arg2[%c0_0, %c0_1] : memref<128x128xf32, #tpu.memory_space<vmem>>, vector<128x128xf32>
    %3 = vector.broadcast %0 : f32 to vector<128x128xf32>
    %4 = arith.mulf %2, %3 : vector<128x128xf32>
    %c0_2 = arith.constant 0 : index
    %c0_3 = arith.constant 0 : index
    %5 = vector.load %arg4[%c0_2, %c0_3] : memref<128x256xf32, #tpu.memory_space<vmem>>, vector<128x128xf32>
    tpu.vector_store %arg4[%c0_2, %c0_3], %4 {strides = array<i32>} : memref<128x256xf32, #tpu.memory_space<vmem>>, vector<128x128xf32>,
    %c0_4 = arith.constant 0 : index
    %c0_5 = arith.constant 0 : index
    %6 = vector.load %arg3[%c0_4, %c0_5] : memref<128x128xf32, #tpu.memory_space<vmem>>, vector<128x128xf32>
    %7 = vector.broadcast %1 : f32 to vector<128x128xf32>
    %8 = arith.mulf %6, %7 : vector<128x128xf32>
    %c0_6 = arith.constant 0 : index
    %c128 = arith.constant 128 : index
    %9 = vector.load %arg4[%c0_6, %c128] : memref<128x256xf32, #tpu.memory_space<vmem>>, vector<128x128xf32>
    tpu.vector_store %arg4[%c0_6, %c128], %8 {strides = array<i32>} : memref<128x256xf32, #tpu.memory_space<vmem>>, vector<128x128xf32>,
    return
  }
  func.func @transform_0(%arg0: i32) -> i32 {
    %c0_i32 = arith.constant 0 : i32
    %c0_i32_0 = arith.constant 0 : i32
    return %c0_i32 : i32
  }
  func.func @transform_1(%arg0: i32) -> (i32, i32) {
    %c0_i32 = arith.constant 0 : i32
    %c0_i32_0 = arith.constant 0 : i32
    return %arg0, %c0_i32 : i32, i32
  }
  func.func @transform_2(%arg0: i32) -> (i32, i32) {
    %c0_i32 = arith.constant 0 : i32
    %c0_i32_0 = arith.constant 0 : i32
    return %arg0, %c0_i32 : i32, i32
  }
  func.func @transform_3(%arg0: i32) -> (i32, i32) {
    %c0_i32 = arith.constant 0 : i32
    %c0_i32_0 = arith.constant 0 : i32
    return %arg0, %c0_i32 : i32, i32
  }
}

</mosaic_0001>

<bundles_post_ra>
// kernel: tpu_custom_call.1
= control target key start
LH: loop header
LB: loop body
LE: loop exit
PB: predicated region body
PF: predicated region fallthrough
CT: control target
= control target key end

     0   :  { %8 = vsyncpa [#allocation5], 0  ;;  %s1034_s0 = inlined_call_operand.hbm [shape: f32[2], index: 0, kind: input, shape index: {}]   ;;  %s1035_s1 = inlined_call_operand.hbm [shape: f32[256,128], index: 1, kind: input, shape index: {}]   ;;  %s1036_s2 = inlined_call_operand.hbm [shape: f32[256,128], index: 2, kind: input, shape index: {}]   ;;  %s1037_s3 = inlined_call_operand.hbm [shape: f32[256,256], index: 3, kind: output, shape index: {}]  }
   0x1   :  { %9 = vsyncpa [#allocation3], 0 }
   0x2   :  { %11 = vsyncpa [#allocation3 + $0x1], 0 }
   0x3   :  { %12 = vsyncpa [#allocation8], 0 }
   0x4   :  { %14 = vsyncpa [#allocation8 + $0x1], 0 }
   0x5   :  { %15 = vsyncpa [#allocation4], 0 }
   0x6   :  { %17 = vsyncpa [#allocation4 + $0x1], 0  ;;  %s728_s12 = smov 0   ;;  %s730_s13 = smov 0  }
   0x7   :  { %s732_s14 = smov 0   ;;  %s734_s15 = smov 0  }
   0x8 LB: > { %s749_s16 = sadd.s32 4294967295, %s698_s15   ;;  %s467_s17 = sadd.s32 4294967294, %s698_s15   ;;  %s698_s15 = sphi %s734_s15, %s1057_s15   ;;  %s694_s14 = sphi %s732_s14, %s1056_s14   ;;  %s690_s13 = sphi %s730_s13, %s1055_s13   ;;  %s686_s12 = sphi %s728_s12, %s1054_s12  }
   0x9   : > { %s753_s18 = sadd.s32 1, %s698_s15   ;;  %s51_s19 = sadd.s32 1, %s694_s14 }
   0xa   : > { %s48_s20 = ssub.s32 %s698_s15, %s753_s18  ;;  %p58_p0 = scmp.ne.s32.totalorder %s694_s14, %s690_s13 }
   0xb   : > { %p49_p1 = scmp.eq.s32.totalorder %s48_s20, 0  ;;  %p59_p2 = scmp.eq.s32.totalorder %s698_s15, 0 }
   0xc   : > { %p64_p3 = scmp.ne.s32.totalorder %s690_s13, %s686_s12  ;;  %p1038_p4 = scmp.eq.s32.totalorder %s749_s16, 0 }
   0xd   : > { %s765_s21 = scalar_select %p49_p1, %s694_s14, %s51_s19  }
   0xe   : > { %p767_p5 = por %p59_p2, %p58_p0  ;;  %p773_p6 = por %p1038_p4, %p64_p3 }
   0xf   : > { %p114_p7 = scmp.eq.s32.totalorder %s749_s16, 1  ;;  %p120_p8 = scmp.eq.s32.totalorder %s467_s17, 1 }
  0x10   : > { %s1042_s23 = scalar_select %p773_p6, 1, 0 }
  0x11   : > { %p468_p9 = scmp.ge.s32.totalorder %s698_s15, 1  ;;  %p127_p10 = scmp.lt.s32.totalorder %s698_s15, 3 }
  0x12   : > { %p780_p11 = por %p114_p7, %p58_p0  ;;  %p784_p12 = por %p120_p8, %p64_p3 }
  0x13   : > { %p788_p13 = pnand %p468_p9, %p127_p10  ;;  %p519_p4 = scmp.lt.s32.totalorder %s698_s15, 2 }
  0x14   : > { %s1043_s24 = scalar_select %p780_p11, 1, 0 }
  0x15   : > { %s1044_s25 = scalar_select %p784_p12, 1, 0 }
  0x16   : > { %p503_p2 = pneg %p788_p13  ;;  %s797_s27 = sand.u32 1, %s694_s14  }
  0x17   : > { %s489_s28 = sshll.u32 %s698_s15, 11  ;;  %p1046_p0 = scmp.eq.s32.totalorder %s749_s16, 0 }
  0x18   : > { %p804_p7 = pnand %p519_p4, %p767_p5  ;;  %s471_s30 = sshll.u32 %s797_s27, 7 }
  0x19   : > { %p504_p3 = pnand %p503_p2, %p1046_p0  ;;  %s700_s4 = smov [#allocation2]  }
  0x1a   : > { %s817_s9 = scalar_lea.hbm %s1035_s1, %s489_s28  ;;  %s153_s10 = scalar_lea.vmem [#allocation6], %s471_s30 }
  0x1b   : > { %506 = dma.hbm_to_smem (!%p504_p3), %s1034_s0, 16, %s700_s4, [#allocation5]  }
  0x1c   : > { %s160_s11 = sshll.u32 %s153_s10, 4  ;;  %s150_s17 = scalar_lea.sflag [#allocation3], %s797_s27  ;;  %s821_s11 = int_to_ptr.vmem [resolvable:$true] %s160_s11 }
  0x1d   : > { %s570_s19 = scalar_lea.hbm %s817_s9, 2048  ;;  %p572_p5 = pneg %p804_p7 }
  0x1e   : > { %p571_p4 = scmp.ne.s32.totalorder %s817_s9, %s570_s19  ;;  %s575_s4 = scalar_lea.hbm %s1035_s1, 4096 }
  0x1f   : > { %p576_p10 = scmp.lt.s32.totalorder %s817_s9, %s1035_s1  ;;  %p577_p2 = scmp.lt.s32.totalorder %s575_s4, %s570_s19 }
  0x20   : > { %p573_p8 = pnand %p572_p5, %p571_p4 }
  0x21   : > { %p578_p0 = por %p577_p2, %p576_p10 }
  0x22   : > { %p574_p9 = pneg %p573_p8 }
  0x24   : > { %p579_p3 = pnand %p578_p0, %p574_p9 }
  0x26   : > { %582 = shalt.err (!%p579_p3)
}
  0x27   : > { %s583_s7 = scalar_lea.vmem %s821_s11, 2048  ;;  %s701_s8 = smov [#allocation6]  }
  0x28   : > { %p584_p1 = scmp.ne.s32.totalorder %s821_s11, %s583_s7  ;;  %s588_s10 = sshll.u32 %s701_s8, 4  ;;  %s589_s10 = int_to_ptr.vmem [resolvable:$false] %s588_s10 }
  0x29   : > { %s590_s20 = scalar_lea.vmem %s589_s10, 4096  ;;  %p591_p12 = scmp.lt.s32.totalorder %s821_s11, %s589_s10 }
  0x2a   : > { %p586_p4 = pnand %p584_p1, %p572_p5  ;;  %p592_p11 = scmp.lt.s32.totalorder %s590_s20, %s583_s7 }
  0x2c   : > { %p587_p8 = pneg %p586_p4  ;;  %p593_p6 = por %p592_p11, %p591_p12 }
  0x2e   : > { %p594_p10 = pnand %p593_p6, %p587_p8 }
  0x30   : > { %597 = shalt.err (!%p594_p10)
}
  0x31   : > { %s702_s19 = smov 128   ;;  %s703_s22 = smov 8  }
  0x32   : > { %510 = dma.hbm_to_vmem [thread:$0]  (!%p804_p7), %s817_s9, 2048, %s821_s11, %s150_s17, %s702_s19, %s702_s19, %s703_s22  }
  0x33   : > { %s858_s6 = scalar_lea.hbm %s1036_s2, %s489_s28  ;;  %s174_s7 = scalar_lea.vmem [#allocation7], %s471_s30 }
  0x34   : > { %s181_s8 = sshll.u32 %s174_s7, 4  ;;  %s171_s10 = scalar_lea.sflag [#allocation8], %s797_s27  ;;  %s862_s8 = int_to_ptr.vmem [resolvable:$true] %s181_s8 }
  0x35   : > { %s598_s20 = scalar_lea.hbm %s858_s6, 2048  ;;  %s603_s28 = scalar_lea.hbm %s1036_s2, 4096 }
  0x36   : > { %p599_p6 = scmp.ne.s32.totalorder %s858_s6, %s598_s20  ;;  %p604_p1 = scmp.lt.s32.totalorder %s858_s6, %s1036_s2 }
  0x37   : > { %p605_p9 = scmp.lt.s32.totalorder %s603_s28, %s598_s20 }
  0x38   : > { %p601_p11 = pnand %p599_p6, %p572_p5 }
  0x39   : > { %p606_p2 = por %p605_p9, %p604_p1 }
  0x3a   : > { %p602_p12 = pneg %p601_p11 }
  0x3c   : > { %p607_p0 = pnand %p606_p2, %p602_p12 }
  0x3e   : > { %610 = shalt.err (!%p607_p0)
}
  0x3f   : > { %s611_s27 = scalar_lea.vmem %s862_s8, 2048  ;;  %s704_s30 = smov [#allocation7]  }
  0x40   : > { %p612_p3 = scmp.ne.s32.totalorder %s862_s8, %s611_s27  ;;  %s616_s5 = sshll.u32 %s704_s30, 4  ;;  %s617_s5 = int_to_ptr.vmem [resolvable:$false] %s616_s5 }
  0x41   : > { %s618_s7 = scalar_lea.vmem %s617_s5, 4096  ;;  %p619_p10 = scmp.lt.s32.totalorder %s862_s8, %s617_s5 }
  0x42   : > { %p614_p4 = pnand %p612_p3, %p572_p5  ;;  %p620_p6 = scmp.lt.s32.totalorder %s618_s7, %s611_s27 }
  0x44   : > { %p615_p8 = pneg %p614_p4  ;;  %p621_p11 = por %p620_p6, %p619_p10 }
  0x46   : > { %p622_p1 = pnand %p621_p11, %p615_p8 }
  0x48   : > { %625 = shalt.err (!%p622_p1)
}
  0x49   : > { %513 = dma.hbm_to_vmem [thread:$0]  (!%p804_p7), %s858_s6, 2048, %s862_s8, %s171_s10, %s702_s19, %s702_s19, %s703_s22  }
  0x4a   : > { %193 = sbr.rel (%p788_p13) target bundleno = 126 (0x7e), region = 32  ;;  %p1048_p5 = scmp.eq.s32.totalorder (!%p788_p13), %s749_s16, 0 }
  0x4f   : > { %669 = dma.done.wait (%p1048_p5), [#allocation5], 16   ;;  %p1049_p12 = pmov %p1048_p5 }
  0x50   : > { %s897_s20 = sand.u32 1, %s690_s13   ;;  %p1050_p7 = scmp.ne.s32.totalorder %s1042_s23, 0 }
  0x51   : > { %671 = vsyncadd (%p1049_p12), [#allocation5], 4294967280  ;;  %s479_s29 = sshll.u32 %s897_s20, 7  ;;  %s200_s9 = scalar_lea.sflag [#allocation3], %s897_s20 }
  0x52   : > { %s901_s11 = scalar_lea.vmem [#allocation6], %s479_s29 }
  0x53   : > { %673 = dma.done.wait (%p1050_p7), %s200_s9, 2048  }
  0x54   : > { %675 = vsyncadd (%p1050_p7), %s200_s9, 4294965248  ;;  %s209_s26 = scalar_lea.sflag [#allocation8], %s897_s20  ;;  %s908_s19 = scalar_lea.vmem [#allocation7], %s479_s29 }
  0x55   : > { %677 = dma.done.wait (%p1050_p7), %s209_s26, 2048  }
  0x56   : > { %679 = vsyncadd (%p1050_p7), %s209_s26, 4294965248 }
  0x57   : > { %217 = sfence }
  0x58   : > { %s244_s22 = sld [smem:[#allocation2]]  ;;  %v246_v0 = vld [vmem:[%s901_s11] sm:$0xff]  ;;  %v247_v1 = vld [vmem:[%s901_s11 + $0x8] sm:$0xff]  ;;  %s481_s23 = sshll.u32 %s897_s20, 8  ;;  %v248_v2 = vld [vmem:[%s901_s11 + $0x10] sm:$0xff] }
  0x59   : > { %v249_v3 = vld [vmem:[%s901_s11 + $0x18] sm:$0xff]  ;;  %v250_v4 = vld [vmem:[%s901_s11 + $0x20] sm:$0xff]  ;;  %s920_s6 = sld [smem:[#allocation2 + $0x1]]  ;;  %v251_v5 = vld [vmem:[%s901_s11 + $0x28] sm:$0xff]  ;;  %s937_s8 = scalar_lea.vmem [#allocation9], %s481_s23 }
  0x5a   : > { %v252_v6 = vld [vmem:[%s901_s11 + $0x30] sm:$0xff]  ;;  %v253_v7 = vld [vmem:[%s901_s11 + $0x38] sm:$0xff]  ;;  %v254_v8 = vld [vmem:[%s901_s11 + $0x40] sm:$0xff]  ;;  %s492_s10 = sshll.u32 %s749_s16, 12  ;;  %s359_s28 = sshll.u32 %s937_s8, 4  ;;  %s979_s28 = int_to_ptr.vmem [resolvable:$true] %s359_s28 }
  0x5b   : > { %v255_v9 = vld [vmem:[%s901_s11 + $0x48] sm:$0xff]  ;;  %v256_v10 = vld [vmem:[%s901_s11 + $0x50] sm:$0xff]  ;;  %v257_v12 = vld [vmem:[%s901_s11 + $0x58] sm:$0xff]  ;;  %s977_s4 = scalar_lea.hbm %s1037_s3, %s492_s10  ;;  %s345_s27 = scalar_lea.sflag [#allocation4], %s897_s20 }
  0x5c   : > { %v258_v13 = vld [vmem:[%s901_s11 + $0x60] sm:$0xff]  ;;  %v259_v14 = vld [vmem:[%s901_s11 + $0x68] sm:$0xff]  ;;  %v260_v19 = vld [vmem:[%s901_s11 + $0x70] sm:$0xff]  ;;  %s626_s30 = scalar_lea.vmem %s979_s28, 4096  ;;  %p1051_p9 = scmp.ne.s32.totalorder %s1043_s24, 0 }
  0x5d   : > { %v261_v20 = vld [vmem:[%s901_s11 + $0x78] sm:$0xff]  ;;  %v295_v21 = vld [vmem:[%s908_s19] sm:$0xff]  ;;  %v296_v26 = vld [vmem:[%s908_s19 + $0x8] sm:$0xff]  ;;  %p627_p13 = scmp.ne.s32.totalorder %s979_s28, %s626_s30  ;;  %s705_s5 = smov [#allocation9]  }
  0x5e   : > { %v262_v11 = vstv %s244_s22  ;;  %v297_v27 = vld [vmem:[%s908_s19 + $0x10] sm:$0xff]  ;;  %v298_v28 = vld [vmem:[%s908_s19 + $0x18] sm:$0xff]  ;;  %v299_v33 = vld [vmem:[%s908_s19 + $0x20] sm:$0xff]  ;;  %s630_s7 = sshll.u32 %s705_s5, 4  ;;  %s631_s7 = int_to_ptr.vmem [resolvable:$false] %s630_s7 }
  0x5f   : > { %v263_v15 = vmul.f32 %v262_v11, %v246_v0  ;;  %v264_v16 = vmul.f32 %v262_v11, %v247_v1  ;;  %v265_v17 = vmul.f32 %v262_v11, %v248_v2  ;;  %v266_v18 = vmul.f32 %v262_v11, %v249_v3  ;;  %v300_v34 = vld [vmem:[%s908_s19 + $0x28] sm:$0xff]  ;;  %v301_v35 = vld [vmem:[%s908_s19 + $0x30] sm:$0xff]  ;;  %v302_v40 = vld [vmem:[%s908_s19 + $0x38] sm:$0xff]  ;;  %p628_p2 = pnand %p627_p13, %p1051_p9  ;;  %s632_s29 = scalar_lea.vmem %s631_s7, 8192 }
  0x60   : > { %v267_v22 = vmul.f32 %v262_v11, %v250_v4  ;;  %v268_v23 = vmul.f32 %v262_v11, %v251_v5  ;;  %v269_v24 = vmul.f32 %v262_v11, %v252_v6  ;;  %v270_v25 = vmul.f32 %v262_v11, %v253_v7  ;;  %v303_v41 = vld [vmem:[%s908_s19 + $0x40] sm:$0xff]  ;;  %v304_v42 = vld [vmem:[%s908_s19 + $0x48] sm:$0xff]  ;;  %v305_v44 = vld [vmem:[%s908_s19 + $0x50] sm:$0xff]  ;;  %p633_p3 = scmp.lt.s32.totalorder %s979_s28, %s631_s7  ;;  %p634_p4 = scmp.lt.s32.totalorder %s632_s29, %s626_s30 }
  0x61   : > { %279 = vst [vmem:[%s937_s8] sm:$0xff] %v263_v15  ;;  %280 = vst [vmem:[%s937_s8 + $0x10] sm:$0xff] %v264_v16  ;;  %v271_v29 = vmul.f32 %v262_v11, %v254_v8  ;;  %v272_v30 = vmul.f32 %v262_v11, %v255_v9  ;;  %v273_v31 = vmul.f32 %v262_v11, %v256_v10  ;;  %v311_v43 = vstv %s920_s6  ;;  %v306_v45 = vld [vmem:[%s908_s19 + $0x58] sm:$0xff]  ;;  %p629_p0 = pneg %p628_p2 }
  0x62   : > { %281 = vst [vmem:[%s937_s8 + $0x20] sm:$0xff] %v265_v17  ;;  %282 = vst [vmem:[%s937_s8 + $0x30] sm:$0xff] %v266_v18  ;;  %v274_v32 = vmul.f32 %v262_v11, %v257_v12  ;;  %v275_v36 = vmul.f32 %v262_v11, %v258_v13  ;;  %v276_v37 = vmul.f32 %v262_v11, %v259_v14  ;;  %v307_v46 = vld [vmem:[%s908_s19 + $0x60] sm:$0xff]  ;;  %v308_v51 = vld [vmem:[%s908_s19 + $0x68] sm:$0xff]  ;;  %p635_p8 = por %p634_p4, %p633_p3 }
  0x63   : > { %283 = vst [vmem:[%s937_s8 + $0x40] sm:$0xff] %v267_v22  ;;  %284 = vst [vmem:[%s937_s8 + $0x50] sm:$0xff] %v268_v23  ;;  %v277_v38 = vmul.f32 %v262_v11, %v260_v19  ;;  %v278_v39 = vmul.f32 %v262_v11, %v261_v20  ;;  %v312_v47 = vmul.f32 %v311_v43, %v295_v21  ;;  %v309_v52 = vld [vmem:[%s908_s19 + $0x70] sm:$0xff]  ;;  %v310_v53 = vld [vmem:[%s908_s19 + $0x78] sm:$0xff] }
  0x64   : > { %285 = vst [vmem:[%s937_s8 + $0x60] sm:$0xff] %v269_v24  ;;  %286 = vst [vmem:[%s937_s8 + $0x70] sm:$0xff] %v270_v25  ;;  %v313_v48 = vmul.f32 %v311_v43, %v296_v26  ;;  %v314_v49 = vmul.f32 %v311_v43, %v297_v27  ;;  %v315_v50 = vmul.f32 %v311_v43, %v298_v28  ;;  %p636_p10 = pnand %p635_p8, %p629_p0 }
  0x65   : > { %287 = vst [vmem:[%s937_s8 + $0x80] sm:$0xff] %v271_v29  ;;  %288 = vst [vmem:[%s937_s8 + $0x90] sm:$0xff] %v272_v30  ;;  %v316_v54 = vmul.f32 %v311_v43, %v299_v33  ;;  %v317_v55 = vmul.f32 %v311_v43, %v300_v34  ;;  %v318_v56 = vmul.f32 %v311_v43, %v301_v35 }
  0x66   : > { %289 = vst [vmem:[%s937_s8 + $0xa0] sm:$0xff] %v273_v31  ;;  %290 = vst [vmem:[%s937_s8 + $0xb0] sm:$0xff] %v274_v32  ;;  %v319_v57 = vmul.f32 %v311_v43, %v302_v40  ;;  %v320_v58 = vmul.f32 %v311_v43, %v303_v41  ;;  %v321_v59 = vmul.f32 %v311_v43, %v304_v42 }
  0x67   : > { %291 = vst [vmem:[%s937_s8 + $0xc0] sm:$0xff] %v275_v36  ;;  %292 = vst [vmem:[%s937_s8 + $0xd0] sm:$0xff] %v276_v37  ;;  %v322_v60 = vmul.f32 %v311_v43, %v305_v44  ;;  %v323_v61 = vmul.f32 %v311_v43, %v306_v45  ;;  %v324_v62 = vmul.f32 %v311_v43, %v307_v46 }
  0x68   : > { %293 = vst [vmem:[%s937_s8 + $0xe0] sm:$0xff] %v277_v38  ;;  %294 = vst [vmem:[%s937_s8 + $0xf0] sm:$0xff] %v278_v39  ;;  %v325_v63 = vmul.f32 %v311_v43, %v308_v51  ;;  %v326_v0 = vmul.f32 %v311_v43, %v309_v52  ;;  %v327_v1 = vmul.f32 %v311_v43, %v310_v53 }
  0x69   : > { %328 = vst [vmem:[%s937_s8 + $0x8] sm:$0xff] %v312_v47  ;;  %329 = vst [vmem:[%s937_s8 + $0x18] sm:$0xff] %v313_v48 }
  0x6a   : > { %330 = vst [vmem:[%s937_s8 + $0x28] sm:$0xff] %v314_v49  ;;  %331 = vst [vmem:[%s937_s8 + $0x38] sm:$0xff] %v315_v50 }
  0x6b   : > { %332 = vst [vmem:[%s937_s8 + $0x48] sm:$0xff] %v316_v54  ;;  %333 = vst [vmem:[%s937_s8 + $0x58] sm:$0xff] %v317_v55 }
  0x6c   : > { %334 = vst [vmem:[%s937_s8 + $0x68] sm:$0xff] %v318_v56  ;;  %335 = vst [vmem:[%s937_s8 + $0x78] sm:$0xff] %v319_v57 }
  0x6d   : > { %336 = vst [vmem:[%s937_s8 + $0x88] sm:$0xff] %v320_v58  ;;  %337 = vst [vmem:[%s937_s8 + $0x98] sm:$0xff] %v321_v59 }
  0x6e   : > { %338 = vst [vmem:[%s937_s8 + $0xa8] sm:$0xff] %v322_v60  ;;  %339 = vst [vmem:[%s937_s8 + $0xb8] sm:$0xff] %v323_v61 }
  0x6f   : > { %340 = vst [vmem:[%s937_s8 + $0xc8] sm:$0xff] %v324_v62  ;;  %341 = vst [vmem:[%s937_s8 + $0xd8] sm:$0xff] %v325_v63 }
  0x70   : > { %342 = vst [vmem:[%s937_s8 + $0xe8] sm:$0xff] %v326_v0  ;;  %343 = vst [vmem:[%s937_s8 + $0xf8] sm:$0xff] %v327_v1 }
  0x71   : > { %639 = shalt.err (!%p636_p10)
}
  0x72   : > { %s640_s9 = scalar_lea.hbm %s977_s4, 4096  ;;  %s644_s19 = scalar_lea.hbm %s1037_s3, 8192 }
  0x73   : > { %p641_p6 = scmp.ne.s32.totalorder %s977_s4, %s640_s9  ;;  %p645_p5 = scmp.lt.s32.totalorder %s977_s4, %s1037_s3 }
  0x74   : > { %p646_p12 = scmp.lt.s32.totalorder %s644_s19, %s640_s9 }
  0x75   : > { %p642_p11 = pnand %p641_p6, %p1051_p9 }
  0x76   : > { %p647_p7 = por %p646_p12, %p645_p5 }
  0x77   : > { %p643_p1 = pneg %p642_p11 }
  0x79   : > { %p648_p13 = pnand %p647_p7, %p643_p1 }
  0x7b   : > { %651 = shalt.err (!%p648_p13)
}
  0x7c   : > { %s706_s6 = smov 256   ;;  %s707_s8 = smov 16  }
  0x7d   : > { %501 = dma.vmem_to_hbm [thread:$0]  (%p1051_p9), %s979_s28, 4096, %s977_s4, %s345_s27, %s706_s6, %s706_s6, %s707_s8  }
  0x7e PF: > { %s374_s10 = sand.u32 1, %s686_s12   ;;  %p1052_p2 = scmp.ne.s32.totalorder %s1044_s25, 0 }
  0x7f   : > { %p1053_p0 = scmp.ge.s32.totalorder %s698_s15, 2  ;;  %s375_s16 = scalar_lea.sflag [#allocation4], %s374_s10 }
  0x81   : > { %p515_p3 = pnand %p1053_p0, %p1052_p2 }
  0x83   : > { %p516_p4 = pneg %p515_p3 }
  0x85   : > { %681 = dma.done.wait (%p516_p4), %s375_s16, 4096  }
  0x86   : > { %683 = vsyncadd (%p516_p4), %s375_s16, 4294963200  ;;  %p20_p8 = scmp.ge.s32.totalorder %s753_s18, 4   ;;  %s1054_s12 = smov %s690_s13 }
  0x87   : > { %s1055_s13 = smov %s694_s14  ;;  %s1056_s14 = smov %s765_s21 }
  0x88   : > { %s1057_s15 = smov %s753_s18  ;;  %22 = sbr.rel (!%p20_p8) target bundleno = 8 (0x8), region = 95 }
  0x8d   :  { %380 = vsyncpa [#allocation3], 1 }
  0x8e   :  { %382 = vsyncpa [#allocation3 + $0x1], 1 }
  0x8f   :  { %383 = vsyncpa [#allocation8], 1 }
  0x90   :  { %385 = vsyncpa [#allocation8 + $0x1], 1 }
  0x91   :  { %386 = vsyncpa [#allocation4], 1 }
  0x92   :  { %388 = vsyncpa [#allocation4 + $0x1], 1 }
  0x93   :  { %389 = vsyncpa [#allocation5], 1 }
  0x94   :  { %391 = vsyncpa [#allocation5 + $0x1], 1 }

</bundles_post_ra>
